<compile_context>
chip_gen: v7x
topology: tpu7x:2x2x1
jax: 0.10.0
libtpu: 0.0.40
codegen_flags: <defaults>
</compile_context>

<pallas_src>
import jax
import jax.numpy as jnp
from jax.experimental import pallas as pl
from jax.experimental.pallas import tpu as pltpu

H1, H2 = 128, 256  # fixed hidden widths from the PyTorch module


def _mlp_kernel(x_ref, w1_ref, b1_ref, w2_ref, b2_ref, w3_ref, b3_ref, out_ref):
    # x_ref block: (TB, num_clothes) — a dense slab of TB batch rows.
    x = x_ref[...]

    # Layer 1: Linear(num_clothes -> 128) + ReLU  (Dropout = eval-mode identity)
    h = jnp.dot(x, w1_ref[...], preferred_element_type=jnp.float32) + b1_ref[...]
    h = jnp.maximum(h, 0.0)

    # Layer 2: Linear(128 -> 256) + ReLU
    h = jnp.dot(h, w2_ref[...], preferred_element_type=jnp.float32) + b2_ref[...]
    h = jnp.maximum(h, 0.0)

    # Layer 3: Linear(256 -> feature_dim)          (Dropout = eval-mode identity)
    y = jnp.dot(h, w3_ref[...], preferred_element_type=jnp.float32) + b3_ref[...]

    # TODO(synk): training-mode dropout (p=0.4) would need pltpu.prng_seed /
    # pltpu.prng_random_bits; this forward is eval-mode (identity).
    out_ref[...] = y.astype(out_ref.dtype)


def _round_up(n, m):
    return ((n + m - 1) // m) * m


def _pick_batch_tile(B, C, D, *, cap=256, vmem_budget=24 << 20):
    """Largest batch tile (multiple of 8, <= cap) whose VMEM footprint fits."""
    weight_bytes = 4 * (C * H1 + H1 + H1 * H2 + H2 + H2 * D + D)
    tb = min(cap, _round_up(B, 8))
    while tb > 8:
        # x tile + out tile are double-buffered; weights resident (count 2x to
        # be safe against per-input double buffering).
        tile_bytes = 2 * 4 * tb * (C + D) + 2 * weight_bytes
        if tile_bytes <= vmem_budget:
            break
        tb //= 2
    return max(8, (tb // 8) * 8)


def clothing_embedding(x, params):
    """x: (B, num_clothes) float32  ->  (B, feature_dim) float32."""
    B, C = x.shape
    D = params["w3_t"].shape[1]

    TB = _pick_batch_tile(B, C, D)
    B_pad = _round_up(B, TB)
    if B_pad != B:
        x = jnp.pad(x, ((0, B_pad - B), (0, 0)))

    full = lambda i: (0, 0)  # grid-invariant blocks (weights stay resident)
    flops = 2 * B_pad * (C * H1 + H1 * H2 + H2 * D)
    bytes_accessed = 4 * (B_pad * C + C * H1 + H1 + H1 * H2 + H2
                          + H2 * D + D + B_pad * D)

    out = pl.pallas_call(
        _mlp_kernel,
        out_shape=jax.ShapeDtypeStruct((B_pad, D), jnp.float32),
        grid_spec=pl.GridSpec(
            grid=(B_pad // TB,),
            in_specs=[
                pl.BlockSpec((TB, C), lambda i: (i, 0)),   # x batch tile
                pl.BlockSpec((C, H1), full),               # W1^T
                pl.BlockSpec((1, H1), full),               # b1
                pl.BlockSpec((H1, H2), full),              # W2^T
                pl.BlockSpec((1, H2), full),               # b2
                pl.BlockSpec((H2, D), full),               # W3^T
                pl.BlockSpec((1, D), full),                # b3
            ],
            out_specs=pl.BlockSpec((TB, D), lambda i: (i, 0)),
        ),
        compiler_params=pltpu.CompilerParams(
            dimension_semantics=("parallel",),
            vmem_limit_bytes=64 << 20),
        cost_estimate=pl.CostEstimate(
            flops=flops, transcendentals=0, bytes_accessed=bytes_accessed),
    )(x, params["w1_t"], params["b1"], params["w2_t"], params["b2"],
      params["w3_t"], params["b3"])
    return out[:B]


def _reference(x, params):
    """Pure-JAX reference mirroring the PyTorch forward (eval mode)."""
    h = jnp.maximum(x @ params["w1_t"] + params["b1"], 0.0)
    h = jnp.maximum(h @ params["w2_t"] + params["b2"], 0.0)
    return h @ params["w3_t"] + params["b3"]


def make_params(num_clothes, feature_dim, key):
    """PyTorch-style uniform init; Linear weights stored pre-transposed."""
    ks = jax.random.split(key, 6)

    def lin(kw, kb, fan_in, fan_out):
        s = 1.0 / (fan_in ** 0.5)
        w_t = jax.random.uniform(kw, (fan_in, fan_out), jnp.float32, -s, s)
        b = jax.random.uniform(kb, (1, fan_out), jnp.float32, -s, s)
        return w_t, b

    w1_t, b1 = lin(ks[0], ks[1], num_clothes, H1)
    w2_t, b2 = lin(ks[2], ks[3], H1, H2)
    w3_t, b3 = lin(ks[4], ks[5], H2, feature_dim)
    return {"w1_t": w1_t, "b1": b1, "w2_t": w2_t, "b2": b2,
            "w3_t": w3_t, "b3": b3}


if __name__ == "__main__":
    B, NUM_CLOTHES, FEATURE_DIM = 8, 16, 512
    key = jax.random.PRNGKey(0)
    kx, kp = jax.random.split(key)

    # One-hot encoded clothing types, as the module expects.
    idx = jax.random.randint(kx, (B,), 0, NUM_CLOTHES)
    x = jax.nn.one_hot(idx, NUM_CLOTHES, dtype=jnp.float32)

    params = make_params(NUM_CLOTHES, FEATURE_DIM, kp)

    out = clothing_embedding(x, params)
    out = jax.block_until_ready(out)

    ref = _reference(x, params)
    assert out.shape == (B, FEATURE_DIM)
    assert jnp.allclose(out, ref, rtol=2e-3, atol=2e-3), "kernel/reference mismatch"
    print("KERNEL_OK")
</pallas_src>

<mosaic_0001>
module attributes {stable_mosaic.version = 11 : i64} {
  func.func @_mlp_kernel(%arg0: i32, %arg1: memref<8x16xf32, #tpu.memory_space<vmem>>, %arg2: memref<16x128xf32, #tpu.memory_space<vmem>>, %arg3: memref<1x128xf32, #tpu.memory_space<vmem>>, %arg4: memref<128x256xf32, #tpu.memory_space<vmem>>, %arg5: memref<1x256xf32, #tpu.memory_space<vmem>>, %arg6: memref<256x512xf32, #tpu.memory_space<vmem>>, %arg7: memref<1x512xf32, #tpu.memory_space<vmem>>, %arg8: memref<8x512xf32, #tpu.memory_space<vmem>>) attributes {dimension_semantics = [#tpu.dimension_semantics<parallel>], iteration_bounds = array<i64: 1>, scalar_prefetch = 0 : i64, scratch_operands = 0 : i64, tpu.core_type = #tpu.core_type<tc>, window_params = [{transform_indices = @transform_0, window_bounds = array<i64: 8, 16>}, {pipeline_mode = #tpu.pipeline_mode<synchronous>, transform_indices = @transform_1, window_bounds = array<i64: 16, 128>}, {pipeline_mode = #tpu.pipeline_mode<synchronous>, transform_indices = @transform_2, window_bounds = array<i64: 1, 128>}, {pipeline_mode = #tpu.pipeline_mode<synchronous>, transform_indices = @transform_3, window_bounds = array<i64: 128, 256>}, {pipeline_mode = #tpu.pipeline_mode<synchronous>, transform_indices = @transform_4, window_bounds = array<i64: 1, 256>}, {pipeline_mode = #tpu.pipeline_mode<synchronous>, transform_indices = @transform_5, window_bounds = array<i64: 256, 512>}, {pipeline_mode = #tpu.pipeline_mode<synchronous>, transform_indices = @transform_6, window_bounds = array<i64: 1, 512>}, {transform_indices = @transform_7, window_bounds = array<i64: 8, 512>}]} {
    %c0 = arith.constant 0 : index
    %c0_0 = arith.constant 0 : index
    %0 = vector.load %arg1[%c0, %c0_0] : memref<8x16xf32, #tpu.memory_space<vmem>>, vector<8x16xf32>
    %c0_1 = arith.constant 0 : index
    %c0_2 = arith.constant 0 : index
    %1 = vector.load %arg2[%c0_1, %c0_2] : memref<16x128xf32, #tpu.memory_space<vmem>>, vector<16x128xf32>
    %cst = arith.constant dense<0.000000e+00> : vector<8x128xf32>
    %2 = tpu.matmul %0, %1, %cst {dimension_numbers = #tpu.dot_dimension_numbers<[1], [0], [0], [1], [0, 0, 1, 1], [], []>} : vector<8x16xf32>, vector<16x128xf32>, vector<8x128xf32> -> vector<8x128xf32>
    %c0_3 = arith.constant 0 : index
    %c0_4 = arith.constant 0 : index
    %3 = vector.load %arg3[%c0_3, %c0_4] : memref<1x128xf32, #tpu.memory_space<vmem>>, vector<1x128xf32>
    %4 = vector.broadcast %3 : vector<1x128xf32> to vector<8x128xf32>
    %5 = arith.addf %2, %4 : vector<8x128xf32>
    %cst_5 = arith.constant 0.000000e+00 : f32
    %6 = vector.broadcast %cst_5 : f32 to vector<8x128xf32>
    %7 = arith.maximumf %5, %6 : vector<8x128xf32>
    %c0_6 = arith.constant 0 : index
    %c0_7 = arith.constant 0 : index
    %8 = vector.load %arg4[%c0_6, %c0_7] : memref<128x256xf32, #tpu.memory_space<vmem>>, vector<128x256xf32>
    %cst_8 = arith.constant dense<0.000000e+00> : vector<8x256xf32>
    %9 = tpu.matmul %7, %8, %cst_8 {dimension_numbers = #tpu.dot_dimension_numbers<[1], [0], [0], [1], [0, 0, 1, 1], [], []>} : vector<8x128xf32>, vector<128x256xf32>, vector<8x256xf32> -> vector<8x256xf32>
    %c0_9 = arith.constant 0 : index
    %c0_10 = arith.constant 0 : index
    %10 = vector.load %arg5[%c0_9, %c0_10] : memref<1x256xf32, #tpu.memory_space<vmem>>, vector<1x256xf32>
    %11 = vector.broadcast %10 : vector<1x256xf32> to vector<8x256xf32>
    %12 = arith.addf %9, %11 : vector<8x256xf32>
    %cst_11 = arith.constant 0.000000e+00 : f32
    %13 = vector.broadcast %cst_11 : f32 to vector<8x256xf32>
    %14 = arith.maximumf %12, %13 : vector<8x256xf32>
    %c0_12 = arith.constant 0 : index
    %c0_13 = arith.constant 0 : index
    %15 = vector.load %arg6[%c0_12, %c0_13] : memref<256x512xf32, #tpu.memory_space<vmem>>, vector<256x512xf32>
    %cst_14 = arith.constant dense<0.000000e+00> : vector<8x512xf32>
    %16 = tpu.matmul %14, %15, %cst_14 {dimension_numbers = #tpu.dot_dimension_numbers<[1], [0], [0], [1], [0, 0, 1, 1], [], []>} : vector<8x256xf32>, vector<256x512xf32>, vector<8x512xf32> -> vector<8x512xf32>
    %c0_15 = arith.constant 0 : index
    %c0_16 = arith.constant 0 : index
    %17 = vector.load %arg7[%c0_15, %c0_16] : memref<1x512xf32, #tpu.memory_space<vmem>>, vector<1x512xf32>
    %18 = vector.broadcast %17 : vector<1x512xf32> to vector<8x512xf32>
    %19 = arith.addf %16, %18 : vector<8x512xf32>
    %c0_17 = arith.constant 0 : index
    %c0_18 = arith.constant 0 : index
    %20 = vector.load %arg8[%c0_17, %c0_18] : memref<8x512xf32, #tpu.memory_space<vmem>>, vector<8x512xf32>
    tpu.vector_store %arg8[%c0_17, %c0_18], %19 {strides = array<i32>} : memref<8x512xf32, #tpu.memory_space<vmem>>, vector<8x512xf32>,
    return
  }
  func.func @transform_0(%arg0: i32) -> (i32, i32) {
    %c0_i32 = arith.constant 0 : i32
    %c0_i32_0 = arith.constant 0 : i32
    return %arg0, %c0_i32 : i32, i32
  }
  func.func @transform_1(%arg0: i32) -> (i32, i32) {
    %c0_i32 = arith.constant 0 : i32
    %c0_i32_0 = arith.constant 0 : i32
    %c0_i32_1 = arith.constant 0 : i32
    return %c0_i32, %c0_i32_0 : i32, i32
  }
  func.func @transform_2(%arg0: i32) -> (i32, i32) {
    %c0_i32 = arith.constant 0 : i32
    %c0_i32_0 = arith.constant 0 : i32
    %c0_i32_1 = arith.constant 0 : i32
    return %c0_i32, %c0_i32_0 : i32, i32
  }
  func.func @transform_3(%arg0: i32) -> (i32, i32) {
    %c0_i32 = arith.constant 0 : i32
    %c0_i32_0 = arith.constant 0 : i32
    %c0_i32_1 = arith.constant 0 : i32
    return %c0_i32, %c0_i32_0 : i32, i32
  }
  func.func @transform_4(%arg0: i32) -> (i32, i32) {
    %c0_i32 = arith.constant 0 : i32
    %c0_i32_0 = arith.constant 0 : i32
    %c0_i32_1 = arith.constant 0 : i32
    return %c0_i32, %c0_i32_0 : i32, i32
  }
  func.func @transform_5(%arg0: i32) -> (i32, i32) {
    %c0_i32 = arith.constant 0 : i32
    %c0_i32_0 = arith.constant 0 : i32
    %c0_i32_1 = arith.constant 0 : i32
    return %c0_i32, %c0_i32_0 : i32, i32
  }
  func.func @transform_6(%arg0: i32) -> (i32, i32) {
    %c0_i32 = arith.constant 0 : i32
    %c0_i32_0 = arith.constant 0 : i32
    %c0_i32_1 = arith.constant 0 : i32
    return %c0_i32, %c0_i32_0 : i32, i32
  }
  func.func @transform_7(%arg0: i32) -> (i32, i32) {
    %c0_i32 = arith.constant 0 : i32
    %c0_i32_0 = arith.constant 0 : i32
    return %arg0, %c0_i32 : i32, i32
  }
}

</mosaic_0001>

<bundles_post_ra>
// kernel: tpu_custom_call.1
= control target key start
LH: loop header
LB: loop body
LE: loop exit
PB: predicated region body
PF: predicated region fallthrough
CT: control target
= control target key end

     0   :  { %12 = vsyncpa [#allocation3], 0  ;;  %s1161_s0 = inlined_call_operand.hbm [shape: f32[8,16], index: 0, kind: input, shape index: {}]   ;;  %s1162_s1 = inlined_call_operand.hbm [shape: f32[16,128], index: 1, kind: input, shape index: {}]   ;;  %s1163_s2 = inlined_call_operand.hbm [shape: f32[1,128], index: 2, kind: input, shape index: {}]   ;;  %s1164_s3 = inlined_call_operand.hbm [shape: f32[128,256], index: 3, kind: input, shape index: {}]   ;;  %s1165_s4 = inlined_call_operand.hbm [shape: f32[1,256], index: 4, kind: input, shape index: {}]   ;;  %s1166_s5 = inlined_call_operand.hbm [shape: f32[256,512], index: 5, kind: input, shape index: {}]   ;;  %s1167_s6 = inlined_call_operand.hbm [shape: f32[1,512], index: 6, kind: input, shape index: {}]   ;;  %s1168_s7 = inlined_call_operand.hbm [shape: f32[8,512], index: 7, kind: output, shape index: {}]  }
   0x1   :  { %13 = vsyncpa [#allocation6], 0 }
   0x2   :  { %14 = vsyncpa [#allocation9], 0 }
   0x3   :  { %15 = vsyncpa [#allocation12], 0 }
   0x4   :  { %16 = vsyncpa [#allocation4], 0  ;;  %s1008_s24 = smov [#allocation5]   ;;  %s822_s28 = scalar_lea.hbm %s1162_s1, 256 }
   0x5   :  { %s32_s25 = sshll.u32 %s1008_s24, 4  ;;  %p823_p0 = scmp.ne.s32.totalorder %s1162_s1, %s822_s28  ;;  %s33_s25 = int_to_ptr.vmem [resolvable:$true] %s32_s25 }
   0x6   :  { %p826_p1 = scmp.lt.u32.totalorder %s822_s28, %s1162_s1 }
   0x8   :  { %p828_p2 = pnand %p826_p1, %p823_p0 }
   0xa   :  { %831 = shalt.err (!%p828_p2)
}
   0xb   :  { %s832_s10 = scalar_lea.vmem %s33_s25, 256  ;;  %p837_p4 = scmp.lt.s32.totalorder %s33_s25, %s33_s25 }
   0xc   :  { %p833_p3 = scmp.ne.s32.totalorder %s33_s25, %s832_s10  ;;  %p838_p5 = scmp.lt.s32.totalorder %s832_s10, %s832_s10 }
   0xe   :  { %p839_p6 = por %p838_p5, %p837_p4 }
  0x10   :  { %p840_p7 = pnand %p839_p6, %p833_p3 }
  0x12   :  { %843 = shalt.err (!%p840_p7)
}
  0x13   :  { %s1009_s11 = smov 128   ;;  %s1010_s12 = smov 8  }
  0x14   :  { %38 = dma.hbm_to_vmem [thread:$0]  %s1162_s1, 256, %s33_s25, [#allocation6], %s1009_s11, %s1009_s11, %s1010_s12  }
  0x15   :  { %s1011_s15 = smov [#allocation8]   ;;  %s844_s19 = scalar_lea.hbm %s1164_s3, 4096 }
  0x16   :  { %s54_s16 = sshll.u32 %s1011_s15, 4  ;;  %p845_p8 = scmp.ne.s32.totalorder %s1164_s3, %s844_s19  ;;  %s55_s16 = int_to_ptr.vmem [resolvable:$true] %s54_s16 }
  0x17   :  { %p848_p9 = scmp.lt.u32.totalorder %s844_s19, %s1164_s3 }
  0x19   :  { %p850_p10 = pnand %p848_p9, %p845_p8 }
  0x1b   :  { %853 = shalt.err (!%p850_p10)
}
  0x1c   :  { %s854_s24 = scalar_lea.vmem %s55_s16, 4096  ;;  %p859_p12 = scmp.lt.s32.totalorder %s55_s16, %s55_s16 }
  0x1d   :  { %p855_p11 = scmp.ne.s32.totalorder %s55_s16, %s854_s24  ;;  %p860_p13 = scmp.lt.s32.totalorder %s854_s24, %s854_s24 }
  0x1f   :  { %p861_p0 = por %p860_p13, %p859_p12 }
  0x21   :  { %p862_p1 = pnand %p861_p0, %p855_p11 }
  0x23   :  { %865 = shalt.err (!%p862_p1)
}
  0x24   :  { %s1012_s1 = smov 256   ;;  %s1013_s25 = smov 16  }
  0x25   :  { %60 = dma.hbm_to_vmem [thread:$0]  %s1164_s3, 4096, %s55_s16, [#allocation9], %s1012_s1, %s1012_s1, %s1013_s25  }
  0x26   :  { %s1014_s28 = smov [#allocation11]   ;;  %s866_s9 = scalar_lea.hbm %s1166_s5, 16384 }
  0x27   :  { %s76_s29 = sshll.u32 %s1014_s28, 4  ;;  %p867_p2 = scmp.ne.s32.totalorder %s1166_s5, %s866_s9  ;;  %s77_s29 = int_to_ptr.vmem [resolvable:$true] %s76_s29 }
  0x28   :  { %p870_p3 = scmp.lt.u32.totalorder %s866_s9, %s1166_s5 }
  0x2a   :  { %p872_p4 = pnand %p870_p3, %p867_p2 }
  0x2c   :  { %875 = shalt.err (!%p872_p4)
}
  0x2d   :  { %s876_s14 = scalar_lea.vmem %s77_s29, 16384  ;;  %p881_p6 = scmp.lt.s32.totalorder %s77_s29, %s77_s29 }
  0x2e   :  { %p877_p5 = scmp.ne.s32.totalorder %s77_s29, %s876_s14  ;;  %p882_p7 = scmp.lt.s32.totalorder %s876_s14, %s876_s14 }
  0x30   :  { %p883_p8 = por %p882_p7, %p881_p6 }
  0x32   :  { %p884_p9 = pnand %p883_p8, %p877_p5 }
  0x34   :  { %887 = shalt.err (!%p884_p9)
}
  0x35   :  { %s1015_s3 = smov 512   ;;  %s1016_s15 = smov 32  }
  0x36   :  { %82 = dma.hbm_to_vmem [thread:$0]  %s1166_s5, 16384, %s77_s29, [#allocation12], %s1015_s3, %s1015_s3, %s1016_s15  }
  0x37   :  { %s1017_s18 = smov [#allocation2]   ;;  %s1018_s20 = smov [#allocation7]  }
  0x38   :  { %s23_s19 = sshll.u32 %s1017_s18, 4  ;;  %s45_s21 = sshll.u32 %s1018_s20, 4  ;;  %s24_s19 = int_to_ptr.vmem [resolvable:$true] %s23_s19  ;;  %s46_s21 = int_to_ptr.vmem [resolvable:$true] %s45_s21 }
  0x39   :  { %s888_s24 = scalar_lea.hbm %s1161_s0, 128 }
  0x3a   :  { %p889_p10 = scmp.ne.s32.totalorder %s1161_s0, %s888_s24  ;;  %p892_p11 = scmp.lt.u32.totalorder %s888_s24, %s1161_s0 }
  0x3c   :  { %p894_p12 = pnand %p892_p11, %p889_p10 }
  0x3e   :  { %897 = shalt.err (!%p894_p12)
}
  0x3f   :  { %s898_s5 = scalar_lea.vmem %s24_s19, 128  ;;  %p903_p0 = scmp.lt.s32.totalorder %s24_s19, %s24_s19 }
  0x40   :  { %p899_p13 = scmp.ne.s32.totalorder %s24_s19, %s898_s5  ;;  %p904_p1 = scmp.lt.s32.totalorder %s898_s5, %s898_s5 }
  0x42   :  { %p905_p2 = por %p904_p1, %p903_p0 }
  0x44   :  { %p906_p3 = pnand %p905_p2, %p899_p13 }
  0x46   :  { %909 = shalt.err (!%p906_p3)
}
  0x47   :  { %26 = dma.hbm_to_vmem [thread:$0]  %s1161_s0, 128, %s24_s19, [#allocation3]  }
  0x48   :  { %s910_s9 = scalar_lea.hbm %s1163_s2, 16 }
  0x49   :  { %p911_p4 = scmp.ne.s32.totalorder %s1163_s2, %s910_s9  ;;  %p914_p5 = scmp.lt.u32.totalorder %s910_s9, %s1163_s2 }
  0x4b   :  { %p916_p6 = pnand %p914_p5, %p911_p4 }
  0x4d   :  { %919 = shalt.err (!%p916_p6)
}
  0x4e   :  { %s920_s14 = scalar_lea.vmem %s46_s21, 16  ;;  %s924_s3 = scalar_lea.vmem %s46_s21, 32 }
  0x4f   :  { %p921_p7 = scmp.ne.s32.totalorder %s46_s21, %s920_s14  ;;  %p925_p8 = scmp.lt.s32.totalorder %s46_s21, %s46_s21 }
  0x50   :  { %p926_p9 = scmp.lt.s32.totalorder %s924_s3, %s920_s14 }
  0x52   :  { %p927_p10 = por %p926_p9, %p925_p8 }
  0x54   :  { %p928_p11 = pnand %p927_p10, %p921_p7 }
  0x56   :  { %931 = shalt.err (!%p928_p11)
}
  0x57   :  { %48 = dma.hbm_to_vmem [thread:$0]  %s1163_s2, 16, %s46_s21, [#allocation6]  }
  0x58   :  { %s1019_s16 = smov [#allocation10]   ;;  %s1020_s18 = smov [#allocation13]  }
  0x59   :  { %s67_s17 = sshll.u32 %s1019_s16, 4  ;;  %s89_s19 = sshll.u32 %s1020_s18, 4  ;;  %s68_s17 = int_to_ptr.vmem [resolvable:$true] %s67_s17  ;;  %s90_s19 = int_to_ptr.vmem [resolvable:$true] %s89_s19 }
  0x5a   :  { %s932_s23 = scalar_lea.hbm %s1165_s4, 32 }
  0x5b   :  { %p933_p12 = scmp.ne.s32.totalorder %s1165_s4, %s932_s23  ;;  %p936_p13 = scmp.lt.u32.totalorder %s932_s23, %s1165_s4 }
  0x5d   :  { %p938_p0 = pnand %p936_p13, %p933_p12 }
  0x5f   :  { %941 = shalt.err (!%p938_p0)
}
  0x60   :  { %s942_s2 = scalar_lea.vmem %s68_s17, 32  ;;  %p947_p2 = scmp.lt.s32.totalorder %s68_s17, %s68_s17 }
  0x61   :  { %p943_p1 = scmp.ne.s32.totalorder %s68_s17, %s942_s2  ;;  %p948_p3 = scmp.lt.s32.totalorder %s942_s2, %s942_s2 }
  0x63   :  { %p949_p4 = por %p948_p3, %p947_p2 }
  0x65   :  { %p950_p5 = pnand %p949_p4, %p943_p1 }
  0x67   :  { %953 = shalt.err (!%p950_p5)
}
  0x68   :  { %70 = dma.hbm_to_vmem [thread:$0]  %s1165_s4, 32, %s68_s17, [#allocation9]  }
  0x69   :  { %s954_s29 = scalar_lea.hbm %s1167_s6, 64 }
  0x6a   :  { %p955_p6 = scmp.ne.s32.totalorder %s1167_s6, %s954_s29  ;;  %p958_p7 = scmp.lt.u32.totalorder %s954_s29, %s1167_s6 }
  0x6c   :  { %p960_p8 = pnand %p958_p7, %p955_p6 }
  0x6e   :  { %963 = shalt.err (!%p960_p8)
}
  0x6f   :  { %s964_s11 = scalar_lea.vmem %s90_s19, 64  ;;  %p969_p10 = scmp.lt.s32.totalorder %s90_s19, %s90_s19 }
  0x70   :  { %p965_p9 = scmp.ne.s32.totalorder %s90_s19, %s964_s11  ;;  %p970_p11 = scmp.lt.s32.totalorder %s964_s11, %s964_s11 }
  0x72   :  { %p971_p12 = por %p970_p11, %p969_p10 }
  0x74   :  { %p972_p13 = pnand %p971_p12, %p965_p9 }
  0x76   :  { %975 = shalt.err (!%p972_p13)
}
  0x77   :  { %92 = dma.hbm_to_vmem [thread:$0]  %s1167_s6, 64, %s90_s19, [#allocation12]  }
  0x78   :  { %998 = dma.done.wait [#allocation3], 128  }
  0x79   :  { %999 = vsyncadd [#allocation3], 4294967168 }
  0x7a   :  { %1000 = dma.done.wait [#allocation6], 272  }
  0x7b   :  { %1001 = vsyncadd [#allocation6], 4294967024 }
  0x7c   :  { %1002 = dma.done.wait [#allocation9], 4128  }
  0x7d   :  { %1003 = vsyncadd [#allocation9], 4294963168 }
  0x7e   :  { %1004 = dma.done.wait [#allocation12], 16448  }
  0x7f   :  { %1005 = vsyncadd [#allocation12], 4294950848  ;;  %v1021_v0 = vmov 0.0|0.0   ;;  %vm1022_vm0 = vmmov 0   ;;  %v1023_v1 = vmov 0.0   ;;  %v115_v2 = vld [vmem:[#allocation5] sm:$0xff] }
  0x80   :  { %642 = vmatprep.subr.bf16.mxu0 %v1021_v0  ;;  %639 = vmatprep.mubr.msk.f32.mxu0 %vm1022_vm0, %v1023_v1  ;;  %v116_v3 = vld [vmem:[#allocation5 + $0x8] sm:$0xff]  ;;  %v114_v5 = vld [vmem:[#allocation2] sm:$0xff]  ;;  %vm124_vm1 = vcmask 130048   ;;  %s1024_s6 = smov [#allocation14]  }
  0x81   :  { %307 = vmatprep.mubr.f32.mxu1 %v1023_v1  ;;  %v643_v4 = vpack.c.bf16 %v116_v3, %v115_v2  ;;  %v200_v6 = vld [vmem:[#allocation8 + $0x8] sm:$0xff]  ;;  %v202_v7 = vld [vmem:[#allocation8 + $0x18] sm:$0xff]  ;;  %v199_v8 = vld [vmem:[#allocation8] sm:$0xff]  ;;  %s618_s13 = sshll.u32 %s1024_s6, 4  ;;  %s619_s13 = int_to_ptr.vmem [resolvable:$true] %s618_s13 }
  0x82   :  { %v645_v9 = vpack.c.bf16 %v202_v7, %v200_v6  ;;  %v201_v10 = vld [vmem:[#allocation8 + $0x10] sm:$0xff]  ;;  %v204_v11 = vld [vmem:[#allocation8 + $0x28] sm:$0xff]  ;;  %v206_v12 = vld [vmem:[#allocation8 + $0x38] sm:$0xff]  ;;  %s976_s14 = scalar_lea.vmem %s619_s13, 512  ;;  %p981_p1 = scmp.lt.s32.totalorder %s619_s13, %s619_s13 }
  0x83   :  { %644 = vmatpush3.bf16.msra.mxu0 %v643_v4  ;;  %v647_v13 = vpack.c.bf16 %v201_v10, %v199_v8  ;;  %v649_v14 = vpack.c.bf16 %v206_v12, %v204_v11  ;;  %v203_v15 = vld [vmem:[#allocation8 + $0x20] sm:$0xff]  ;;  %v205_v16 = vld [vmem:[#allocation8 + $0x30] sm:$0xff]  ;;  %v208_v17 = vld [vmem:[#allocation8 + $0x48] sm:$0xff]  ;;  %p977_p0 = scmp.ne.s32.totalorder %s619_s13, %s976_s14  ;;  %p982_p2 = scmp.lt.s32.totalorder %s976_s14, %s976_s14 }
  0x84   :  { %646 = vmatprep.subr.bf16.mxu1 %v645_v9  ;;  %v210_v18 = vld [vmem:[#allocation8 + $0x58] sm:$0xff]  ;;  %v651_v19 = vpack.c.bf16 %v205_v16, %v203_v15  ;;  %v207_v21 = vld [vmem:[#allocation8 + $0x40] sm:$0xff]  ;;  %v209_v22 = vld [vmem:[#allocation8 + $0x50] sm:$0xff] }
  0x85   :  { %648 = vmatpush1.bf16.msra.mxu1 %v647_v13  ;;  %v653_v20 = vpack.c.bf16 %v210_v18, %v208_v17  ;;  %v212_v23 = vld [vmem:[#allocation8 + $0x68] sm:$0xff]  ;;  %v214_v24 = vld [vmem:[#allocation8 + $0x78] sm:$0xff]  ;;  %v655_v25 = vpack.c.bf16 %v209_v22, %v207_v21  ;;  %v211_v27 = vld [vmem:[#allocation8 + $0x60] sm:$0xff]  ;;  %p983_p3 = por %p982_p2, %p981_p1 }
  0x86   :  { %640 = vmatmul.mubr.msk.f32.vlgmr.msra.gmra.mrb[0].mxu0 %vm124_vm1, %v114_v5  ;;  %650 = vmatprep.subr.bf16.mxu1 %v649_v14  ;;  %v657_v26 = vpack.c.bf16 %v214_v24, %v212_v23  ;;  %v213_v28 = vld [vmem:[#allocation8 + $0x70] sm:$0xff]  ;;  %v216_v29 = vld [vmem:[#allocation8 + $0x88] sm:$0xff]  ;;  %v218_v30 = vld [vmem:[#allocation8 + $0x98] sm:$0xff] }
  0x87   :  { %v659_v31 = vpack.c.bf16 %v213_v28, %v211_v27  ;;  %v661_v32 = vpack.c.bf16 %v218_v30, %v216_v29  ;;  %v215_v33 = vld [vmem:[#allocation8 + $0x80] sm:$0xff]  ;;  %v217_v34 = vld [vmem:[#allocation8 + $0x90] sm:$0xff]  ;;  %v220_v35 = vld [vmem:[#allocation8 + $0xa8] sm:$0xff]  ;;  %p984_p4 = pnand %p983_p3, %p977_p0 }
  0x88   :  { %v222_v36 = vld [vmem:[#allocation8 + $0xb8] sm:$0xff]  ;;  %v663_v37 = vpack.c.bf16 %v217_v34, %v215_v33  ;;  %v219_v39 = vld [vmem:[#allocation8 + $0xa0] sm:$0xff]  ;;  %v221_v40 = vld [vmem:[#allocation8 + $0xb0] sm:$0xff] }
  0x89   :  { %652 = vmatpush1.bf16.msra.mxu1 %v651_v19  ;;  %v665_v38 = vpack.c.bf16 %v222_v36, %v220_v35  ;;  %v224_v41 = vld [vmem:[#allocation8 + $0xc8] sm:$0xff]  ;;  %v226_v42 = vld [vmem:[#allocation8 + $0xd8] sm:$0xff]  ;;  %v667_v43 = vpack.c.bf16 %v221_v40, %v219_v39  ;;  %v223_v45 = vld [vmem:[#allocation8 + $0xc0] sm:$0xff] }
  0x8a   :  { %654 = vmatprep.subr.bf16.mxu1 %v653_v20  ;;  %v669_v44 = vpack.c.bf16 %v226_v42, %v224_v41  ;;  %v225_v46 = vld [vmem:[#allocation8 + $0xd0] sm:$0xff]  ;;  %v228_v48 = vld [vmem:[#allocation8 + $0xe8] sm:$0xff]  ;;  %v230_v49 = vld [vmem:[#allocation8 + $0xf8] sm:$0xff] }
  0x8b   :  { %v671_v47 = vpack.c.bf16 %v225_v46, %v223_v45  ;;  %v673_v50 = vpack.c.bf16 %v230_v49, %v228_v48  ;;  %v227_v51 = vld [vmem:[#allocation8 + $0xe0] sm:$0xff]  ;;  %v229_v52 = vld [vmem:[#allocation8 + $0xf0] sm:$0xff] }
  0x8c   :  { %v675_v53 = vpack.c.bf16 %v229_v52, %v227_v51  ;;  %v317_v54 = vld [vmem:[#allocation11 + $0x8] sm:$0xff]  ;;  %v319_v56 = vld [vmem:[#allocation11 + $0x18] sm:$0xff]  ;;  %v316_v59 = vld [vmem:[#allocation11] sm:$0xff] }
  0x8d   :  { %656 = vmatpush1.bf16.msra.mxu1 %v655_v25  ;;  %v321_v55 = vld [vmem:[#allocation11 + $0x28] sm:$0xff]  ;;  %v323_v58 = vld [vmem:[#allocation11 + $0x38] sm:$0xff]  ;;  %v320_v60 = vld [vmem:[#allocation11 + $0x20] sm:$0xff] }
  0x8e   :  { %658 = vmatprep.subr.bf16.mxu1 %v657_v26  ;;  %v677_v57 = vpack.c.bf16 %v321_v55, %v317_v54  ;;  %v741_v61 = vpack.c.bf16 %v323_v58, %v319_v56  ;;  %v679_v62 = vpack.c.bf16 %v320_v60, %v316_v59  ;;  %v325_v63 = vld [vmem:[#allocation11 + $0x48] sm:$0xff]  ;;  %v324_v2 = vld [vmem:[#allocation11 + $0x40] sm:$0xff] }
  0x8f   :  { %v329_v0 = vld [vmem:[#allocation11 + $0x68] sm:$0xff]  ;;  %v328_v3 = vld [vmem:[#allocation11 + $0x60] sm:$0xff] }
  0x90   :  { %678 = vmatprep.subr.bf16.mxu0 %v677_v57  ;;  %v681_v1 = vpack.c.bf16 %v329_v0, %v325_v63  ;;  %v683_v4 = vpack.c.bf16 %v328_v3, %v324_v2  ;;  %v333_v5 = vld [vmem:[#allocation11 + $0x88] sm:$0xff]  ;;  %v332_v8 = vld [vmem:[#allocation11 + $0x80] sm:$0xff] }
  0x91   :  { %660 = vmatpush1.bf16.msra.mxu1 %v659_v31  ;;  %680 = vmatpush1.bf16.msra.mxu0 %v679_v62  ;;  %v337_v6 = vld [vmem:[#allocation11 + $0xa8] sm:$0xff]  ;;  %v336_v9 = vld [vmem:[#allocation11 + $0xa0] sm:$0xff] }
  0x92   :  { %662 = vmatprep.subr.bf16.mxu1 %v661_v32  ;;  %682 = vmatprep.subr.bf16.mxu0 %v681_v1  ;;  %v685_v7 = vpack.c.bf16 %v337_v6, %v333_v5  ;;  %v687_v10 = vpack.c.bf16 %v336_v9, %v332_v8  ;;  %v341_v11 = vld [vmem:[#allocation11 + $0xc8] sm:$0xff]  ;;  %v340_v14 = vld [vmem:[#allocation11 + $0xc0] sm:$0xff] }
  0x93   :  { %v345_v12 = vld [vmem:[#allocation11 + $0xe8] sm:$0xff]  ;;  %v344_v15 = vld [vmem:[#allocation11 + $0xe0] sm:$0xff] }
  0x94   :  { %v689_v13 = vpack.c.bf16 %v345_v12, %v341_v11  ;;  %v691_v16 = vpack.c.bf16 %v344_v15, %v340_v14  ;;  %v349_v17 = vld [vmem:[#allocation11 + $0x108] sm:$0xff]  ;;  %v348_v20 = vld [vmem:[#allocation11 + $0x100] sm:$0xff] }
  0x95   :  { %664 = vmatpush1.bf16.msra.mxu1 %v663_v37  ;;  %684 = vmatpush1.bf16.msra.mxu0 %v683_v4  ;;  %v353_v18 = vld [vmem:[#allocation11 + $0x128] sm:$0xff]  ;;  %v352_v21 = vld [vmem:[#allocation11 + $0x120] sm:$0xff] }
  0x96   :  { %666 = vmatprep.subr.bf16.mxu1 %v665_v38  ;;  %686 = vmatprep.subr.bf16.mxu0 %v685_v7  ;;  %v693_v19 = vpack.c.bf16 %v353_v18, %v349_v17  ;;  %v695_v22 = vpack.c.bf16 %v352_v21, %v348_v20  ;;  %v357_v23 = vld [vmem:[#allocation11 + $0x148] sm:$0xff]  ;;  %v356_v26 = vld [vmem:[#allocation11 + $0x140] sm:$0xff]  ;;  %v318_v17 = vld [vmem:[#allocation11 + $0x10] sm:$0xff] }
  0x97   :  { %v361_v24 = vld [vmem:[#allocation11 + $0x168] sm:$0xff]  ;;  %v360_v27 = vld [vmem:[#allocation11 + $0x160] sm:$0xff]  ;;  %v322_v18 = vld [vmem:[#allocation11 + $0x30] sm:$0xff] }
  0x98   :  { %v697_v25 = vpack.c.bf16 %v361_v24, %v357_v23  ;;  %v699_v28 = vpack.c.bf16 %v360_v27, %v356_v26  ;;  %v365_v29 = vld [vmem:[#allocation11 + $0x188] sm:$0xff]  ;;  %v364_v32 = vld [vmem:[#allocation11 + $0x180] sm:$0xff]  ;;  %v327_v20 = vld [vmem:[#allocation11 + $0x58] sm:$0xff]  ;;  %v743_v24 = vpack.c.bf16 %v322_v18, %v318_v17 }
  0x99   :  { %668 = vmatpush1.bf16.msra.mxu1 %v667_v43  ;;  %688 = vmatpush1.bf16.msra.mxu0 %v687_v10  ;;  %v369_v30 = vld [vmem:[#allocation11 + $0x1a8] sm:$0xff]  ;;  %v368_v33 = vld [vmem:[#allocation11 + $0x1a0] sm:$0xff]  ;;  %v331_v21 = vld [vmem:[#allocation11 + $0x78] sm:$0xff] }
  0x9a   :  { %670 = vmatprep.subr.bf16.mxu1 %v669_v44  ;;  %690 = vmatprep.subr.bf16.mxu0 %v689_v13  ;;  %v701_v31 = vpack.c.bf16 %v369_v30, %v365_v29  ;;  %v703_v34 = vpack.c.bf16 %v368_v33, %v364_v32  ;;  %v373_v35 = vld [vmem:[#allocation11 + $0x1c8] sm:$0xff]  ;;  %v372_v38 = vld [vmem:[#allocation11 + $0x1c0] sm:$0xff]  ;;  %v745_v26 = vpack.c.bf16 %v331_v21, %v327_v20  ;;  %v326_v27 = vld [vmem:[#allocation11 + $0x50] sm:$0xff] }
  0x9b   :  { %v377_v36 = vld [vmem:[#allocation11 + $0x1e8] sm:$0xff]  ;;  %v376_v39 = vld [vmem:[#allocation11 + $0x1e0] sm:$0xff]  ;;  %v335_v29 = vld [vmem:[#allocation11 + $0x98] sm:$0xff] }
  0x9c   :  { %v705_v37 = vpack.c.bf16 %v377_v36, %v373_v35  ;;  %v707_v40 = vpack.c.bf16 %v376_v39, %v372_v38  ;;  %v381_v41 = vld [vmem:[#allocation11 + $0x208] sm:$0xff]  ;;  %v380_v44 = vld [vmem:[#allocation11 + $0x200] sm:$0xff]  ;;  %v339_v30 = vld [vmem:[#allocation11 + $0xb8] sm:$0xff] }
  0x9d   :  { %672 = vmatpush1.bf16.msra.mxu1 %v671_v47  ;;  %692 = vmatpush1.bf16.msra.mxu0 %v691_v16  ;;  %v385_v42 = vld [vmem:[#allocation11 + $0x228] sm:$0xff]  ;;  %v384_v45 = vld [vmem:[#allocation11 + $0x220] sm:$0xff]  ;;  %v630_v16 = vld [vmem:[#allocation7] ss:$0 sm:$0xff]  ;;  %v749_v32 = vpack.c.bf16 %v339_v30, %v335_v29 }
  0x9e   :  { %674 = vmatprep.subr.bf16.mxu1 %v673_v50  ;;  %694 = vmatprep.subr.bf16.mxu0 %v693_v19  ;;  %v709_v43 = vpack.c.bf16 %v385_v42, %v381_v41  ;;  %v711_v46 = vpack.c.bf16 %v384_v45, %v380_v44  ;;  %v389_v47 = vld [vmem:[#allocation11 + $0x248] sm:$0xff]  ;;  %v388_v50 = vld [vmem:[#allocation11 + $0x240] sm:$0xff]  ;;  %v334_v33 = vld [vmem:[#allocation11 + $0x90] sm:$0xff] }
  0x9f   :  { %v393_v48 = vld [vmem:[#allocation11 + $0x268] sm:$0xff]  ;;  %v392_v51 = vld [vmem:[#allocation11 + $0x260] sm:$0xff]  ;;  %v343_v35 = vld [vmem:[#allocation11 + $0xd8] sm:$0xff] }
  0xa0   :  { %v713_v49 = vpack.c.bf16 %v393_v48, %v389_v47  ;;  %v715_v52 = vpack.c.bf16 %v392_v51, %v388_v50  ;;  %v401_v54 = vld [vmem:[#allocation11 + $0x2a8] sm:$0xff]  ;;  %v396_v56 = vld [vmem:[#allocation11 + $0x280] sm:$0xff]  ;;  %v347_v36 = vld [vmem:[#allocation11 + $0xf8] sm:$0xff] }
  0xa1   :  { %676 = vmatpush1.bf16.msra.mxu1 %v675_v53  ;;  %696 = vmatpush1.bf16.msra.mxu0 %v695_v22  ;;  %v397_v53 = vld [vmem:[#allocation11 + $0x288] sm:$0xff]  ;;  %v400_v57 = vld [vmem:[#allocation11 + $0x2a0] sm:$0xff]  ;;  %v753_v38 = vpack.c.bf16 %v347_v36, %v343_v35  ;;  %v342_v39 = vld [vmem:[#allocation11 + $0xd0] sm:$0xff] }
  0xa2   :  { %742 = vmatprep.subr.bf16.mxu1 %v741_v61  ;;  %698 = vmatprep.subr.bf16.mxu0 %v697_v25  ;;  %v717_v55 = vpack.c.bf16 %v401_v54, %v397_v53  ;;  %v719_v58 = vpack.c.bf16 %v400_v57, %v396_v56  ;;  %v405_v59 = vld [vmem:[#allocation11 + $0x2c8] sm:$0xff]  ;;  %v404_v62 = vld [vmem:[#allocation11 + $0x2c0] sm:$0xff]  ;;  %v351_v41 = vld [vmem:[#allocation11 + $0x118] sm:$0xff] }
  0xa3   :  { %v409_v60 = vld [vmem:[#allocation11 + $0x2e8] sm:$0xff]  ;;  %v408_v63 = vld [vmem:[#allocation11 + $0x2e0] sm:$0xff]  ;;  %v355_v42 = vld [vmem:[#allocation11 + $0x138] sm:$0xff] }
  0xa4   :  { %v721_v61 = vpack.c.bf16 %v409_v60, %v405_v59  ;;  %v723_v0 = vpack.c.bf16 %v408_v63, %v404_v62  ;;  %v413_v1 = vld [vmem:[#allocation11 + $0x308] sm:$0xff]  ;;  %v412_v4 = vld [vmem:[#allocation11 + $0x300] sm:$0xff]  ;;  %v757_v44 = vpack.c.bf16 %v355_v42, %v351_v41  ;;  %v350_v45 = vld [vmem:[#allocation11 + $0x110] sm:$0xff] }
  0xa5   :  { %700 = vmatpush1.bf16.msra.mxu0 %v699_v28  ;;  %v417_v2 = vld [vmem:[#allocation11 + $0x328] sm:$0xff]  ;;  %v416_v5 = vld [vmem:[#allocation11 + $0x320] sm:$0xff]  ;;  %v330_v28 = vld [vmem:[#allocation11 + $0x70] sm:$0xff] }
  0xa6   :  { %702 = vmatprep.subr.bf16.mxu0 %v701_v31  ;;  %v725_v3 = vpack.c.bf16 %v417_v2, %v413_v1  ;;  %v727_v6 = vpack.c.bf16 %v416_v5, %v412_v4  ;;  %v421_v7 = vld [vmem:[#allocation11 + $0x348] sm:$0xff]  ;;  %v420_v10 = vld [vmem:[#allocation11 + $0x340] sm:$0xff]  ;;  %v747_v31 = vpack.c.bf16 %v330_v28, %v326_v27  ;;  %v359_v47 = vld [vmem:[#allocation11 + $0x158] sm:$0xff] }
  0xa7   :  { %v425_v8 = vld [vmem:[#allocation11 + $0x368] sm:$0xff]  ;;  %v424_v11 = vld [vmem:[#allocation11 + $0x360] sm:$0xff]  ;;  %v363_v48 = vld [vmem:[#allocation11 + $0x178] sm:$0xff] }
  0xa8   :  { %v729_v9 = vpack.c.bf16 %v425_v8, %v421_v7  ;;  %v731_v12 = vpack.c.bf16 %v424_v11, %v420_v10  ;;  %v429_v13 = vld [vmem:[#allocation11 + $0x388] sm:$0xff]  ;;  %v761_v50 = vpack.c.bf16 %v363_v48, %v359_v47  ;;  %v358_v51 = vld [vmem:[#allocation11 + $0x150] sm:$0xff]  ;;  %v367_v53 = vld [vmem:[#allocation11 + $0x198] sm:$0xff] }
  0xa9   :  { %704 = vmatpush1.bf16.msra.mxu0 %v703_v34  ;;  %v433_v14 = vld [vmem:[#allocation11 + $0x3a8] sm:$0xff]  ;;  %v338_v34 = vld [vmem:[#allocation11 + $0xb0] sm:$0xff]  ;;  %v371_v54 = vld [vmem:[#allocation11 + $0x1b8] sm:$0xff] }
  0xaa   :  { %706 = vmatprep.subr.bf16.mxu0 %v705_v37  ;;  %v733_v15 = vpack.c.bf16 %v433_v14, %v429_v13  ;;  %v751_v37 = vpack.c.bf16 %v338_v34, %v334_v33  ;;  %v765_v56 = vpack.c.bf16 %v371_v54, %v367_v53  ;;  %v366_v57 = vld [vmem:[#allocation11 + $0x190] sm:$0xff]  ;;  %v375_v59 = vld [vmem:[#allocation11 + $0x1d8] sm:$0xff]  ;;  %v428_v41 = vld [vmem:[#allocation11 + $0x380] sm:$0xff] }
  0xab   :  { %v379_v60 = vld [vmem:[#allocation11 + $0x1f8] sm:$0xff]  ;;  %v374_v63 = vld [vmem:[#allocation11 + $0x1d0] sm:$0xff]  ;;  %v432_v42 = vld [vmem:[#allocation11 + $0x3a0] sm:$0xff] }
  0xac   :  { %v769_v62 = vpack.c.bf16 %v379_v60, %v375_v59  ;;  %v383_v1 = vld [vmem:[#allocation11 + $0x218] sm:$0xff]  ;;  %v382_v5 = vld [vmem:[#allocation11 + $0x210] sm:$0xff]  ;;  %v437_v47 = vld [vmem:[#allocation11 + $0x3c8] sm:$0xff]  ;;  %v233_v59 = vlaneseq }
  0xad   :  { %708 = vmatpush1.bf16.msra.mxu0 %v707_v40  ;;  %v346_v40 = vld [vmem:[#allocation11 + $0xf0] sm:$0xff]  ;;  %v387_v2 = vld [vmem:[#allocation11 + $0x238] sm:$0xff]  ;;  %v441_v48 = vld [vmem:[#allocation11 + $0x3e8] sm:$0xff] }
  0xae   :  { %710 = vmatprep.subr.bf16.mxu0 %v709_v43  ;;  %v755_v43 = vpack.c.bf16 %v346_v40, %v342_v39  ;;  %v773_v4 = vpack.c.bf16 %v387_v2, %v383_v1  ;;  %v391_v7 = vld [vmem:[#allocation11 + $0x258] sm:$0xff]  ;;  %v390_v11 = vld [vmem:[#allocation11 + $0x250] sm:$0xff]  ;;  %v440_v53 = vld [vmem:[#allocation11 + $0x3e0] sm:$0xff]  ;;  %v234_v60 = vshrl.u32 %v233_v59, 7 }
  0xaf   :  { %v395_v8 = vld [vmem:[#allocation11 + $0x278] sm:$0xff]  ;;  %v398_v17 = vld [vmem:[#allocation11 + $0x290] sm:$0xff] }
  0xb0   :  { %v777_v10 = vpack.c.bf16 %v395_v8, %v391_v7  ;;  %v399_v13 = vld [vmem:[#allocation11 + $0x298] sm:$0xff]  ;;  %v402_v18 = vld [vmem:[#allocation11 + $0x2b0] sm:$0xff]  ;;  %v456_v8 = vsub.s32 2, %v234_v60 }
  0xb1   :  { %712 = vmatpush1.bf16.msra.mxu0 %v711_v46  ;;  %v354_v46 = vld [vmem:[#allocation11 + $0x130] sm:$0xff]  ;;  %v403_v14 = vld [vmem:[#allocation11 + $0x2b8] sm:$0xff]  ;;  %v783_v21 = vpack.c.bf16 %v402_v18, %v398_v17 }
  0xb2   :  { %714 = vmatprep.subr.bf16.mxu0 %v713_v49  ;;  %v759_v49 = vpack.c.bf16 %v354_v46, %v350_v45  ;;  %v411_v20 = vld [vmem:[#allocation11 + $0x2f8] sm:$0xff]  ;;  %v414_v29 = vld [vmem:[#allocation11 + $0x310] sm:$0xff] }
  0xb3   :  { %v418_v30 = vld [vmem:[#allocation11 + $0x330] sm:$0xff] }
  0xb4   :  { %v791_v33 = vpack.c.bf16 %v418_v30, %v414_v29  ;;  %v422_v35 = vld [vmem:[#allocation11 + $0x350] sm:$0xff] }
  0xb5   :  { %716 = vmatpush1.bf16.msra.mxu0 %v715_v52  ;;  %v362_v52 = vld [vmem:[#allocation11 + $0x170] sm:$0xff] }
  0xb6   :  { %718 = vmatprep.subr.bf16.mxu0 %v717_v55  ;;  %v763_v55 = vpack.c.bf16 %v362_v52, %v358_v51  ;;  %v426_v36 = vld [vmem:[#allocation11 + $0x370] sm:$0xff]  ;;  %v443_v51 = vld [vmem:[#allocation11 + $0x3f8] sm:$0xff]  ;;  %v436_v52 = vld [vmem:[#allocation11 + $0x3c0] sm:$0xff] }
  0xb7   :  { %v795_v39 = vpack.c.bf16 %v426_v36, %v422_v35  ;;  %v434_v45 = vld [vmem:[#allocation11 + $0x3b0] sm:$0xff] }
  0xb9   :  { %720 = vmatpush1.bf16.msra.mxu0 %v719_v58  ;;  %v370_v58 = vld [vmem:[#allocation11 + $0x1b0] sm:$0xff] }
  0xba   :  { %722 = vmatprep.subr.bf16.mxu0 %v721_v61  ;;  %v767_v61 = vpack.c.bf16 %v370_v58, %v366_v57  ;;  %v442_v57 = vld [vmem:[#allocation11 + $0x3f0] sm:$0xff] }
  0xbd   :  { %724 = vmatpush1.bf16.msra.mxu0 %v723_v0  ;;  %v378_v0 = vld [vmem:[#allocation11 + $0x1f0] sm:$0xff] }
  0xbe   :  { %726 = vmatprep.subr.bf16.mxu0 %v725_v3  ;;  %v771_v3 = vpack.c.bf16 %v378_v0, %v374_v63  ;;  %v239_v63 = vsub.s32 1, %v234_v60 }
  0xc1   :  { %728 = vmatpush1.bf16.msra.mxu0 %v727_v6  ;;  %v386_v6 = vld [vmem:[#allocation11 + $0x230] sm:$0xff] }
  0xc2   :  { %730 = vmatprep.subr.bf16.mxu0 %v729_v9  ;;  %v775_v9 = vpack.c.bf16 %v386_v6, %v382_v5 }
  0xc5   :  { %732 = vmatpush1.bf16.msra.mxu0 %v731_v12  ;;  %v394_v12 = vld [vmem:[#allocation11 + $0x270] sm:$0xff] }
  0xc6   :  { %734 = vmatprep.subr.bf16.mxu0 %v733_v15  ;;  %v779_v15 = vpack.c.bf16 %v394_v12, %v390_v11 }
 0x159   :  { %v194_v19 = vpop.f32.mrb[0].mxu0 }
 0x15a   :  { %v195_v22 = vadd.f32 %v630_v16, %v194_v19  ;;  %v641_v23 = vpop.f32.mrb[1].mxu0  ;;  %v781_v16 = vpack.c.bf16 %v403_v14, %v399_v13  ;;  %v407_v19 = vld [vmem:[#allocation11 + $0x2d8] sm:$0xff] }
 0x15b   :  { %v406_v23 = vld [vmem:[#allocation11 + $0x2d0] sm:$0xff] }
 0x15c   :  { %v198_v25 = vmax.f32 %v195_v22, 0.0  ;;  %v785_v22 = vpack.c.bf16 %v411_v20, %v407_v19 }
 0x15e   :  { %308 = vmatmul.mubr.f32.vlgmr.msra.gmra.mrb[0].mxu1 %v198_v25  ;;  %v415_v25 = vld [vmem:[#allocation11 + $0x318] sm:$0xff] }
 0x15f   :  { %744 = vmatpush1.bf16.msra.mxu1 %v743_v24  ;;  %v410_v24 = vld [vmem:[#allocation11 + $0x2f0] sm:$0xff] }
 0x160   :  { %746 = vmatprep.subr.bf16.mxu1 %v745_v26  ;;  %v419_v26 = vld [vmem:[#allocation11 + $0x338] sm:$0xff]  ;;  %v787_v27 = vpack.c.bf16 %v410_v24, %v406_v23 }
 0x161   :  { %v789_v28 = vpack.c.bf16 %v419_v26, %v415_v25 }
 0x163   :  { %748 = vmatpush1.bf16.msra.mxu1 %v747_v31  ;;  %v423_v31 = vld [vmem:[#allocation11 + $0x358] sm:$0xff] }
 0x164   :  { %750 = vmatprep.subr.bf16.mxu1 %v749_v32  ;;  %v427_v32 = vld [vmem:[#allocation11 + $0x378] sm:$0xff] }
 0x165   :  { %v793_v34 = vpack.c.bf16 %v427_v32, %v423_v31 }
 0x167   :  { %752 = vmatpush1.bf16.msra.mxu1 %v751_v37  ;;  %v431_v37 = vld [vmem:[#allocation11 + $0x398] sm:$0xff] }
 0x168   :  { %754 = vmatprep.subr.bf16.mxu1 %v753_v38  ;;  %v435_v38 = vld [vmem:[#allocation11 + $0x3b8] sm:$0xff] }
 0x169   :  { %v797_v40 = vpack.c.bf16 %v435_v38, %v431_v37 }
 0x16b   :  { %756 = vmatpush1.bf16.msra.mxu1 %v755_v43  ;;  %v430_v43 = vld [vmem:[#allocation11 + $0x390] sm:$0xff] }
 0x16c   :  { %758 = vmatprep.subr.bf16.mxu1 %v757_v44  ;;  %v735_v44 = vpack.c.bf16 %v432_v42, %v428_v41  ;;  %v799_v46 = vpack.c.bf16 %v434_v45, %v430_v43 }
 0x16e   :  { %736 = vmatpush1.bf16.msra.mxu0 %v735_v44 }
 0x16f   :  { %760 = vmatpush1.bf16.msra.mxu1 %v759_v49  ;;  %v439_v49 = vld [vmem:[#allocation11 + $0x3d8] sm:$0xff] }
 0x170   :  { %762 = vmatprep.subr.bf16.mxu1 %v761_v50  ;;  %v737_v50 = vpack.c.bf16 %v441_v48, %v437_v47  ;;  %v801_v54 = vpack.c.bf16 %v443_v51, %v439_v49 }
 0x172   :  { %738 = vmatprep.subr.bf16.mxu0 %v737_v50 }
 0x173   :  { %764 = vmatpush1.bf16.msra.mxu1 %v763_v55  ;;  %v739_v55 = vpack.c.bf16 %v440_v53, %v436_v52 }
 0x174   :  { %766 = vmatprep.subr.bf16.mxu1 %v765_v56  ;;  %v438_v56 = vld [vmem:[#allocation11 + $0x3d0] sm:$0xff] }
 0x175   :  { %v803_v58 = vpack.c.bf16 %v442_v57, %v438_v56  ;;  %740 = vmatpush1.bf16.msra.mxu0 %v739_v55 }
 0x177   :  { %768 = vmatpush1.bf16.msra.mxu1 %v767_v61  ;;  %v235_v61 = vsub.s32 0, %v234_v60 }
 0x178   :  { %770 = vmatprep.subr.bf16.mxu1 %v769_v62  ;;  %v231_v62 = vld [vmem:[#allocation10] sm:$0x3] }
 0x179   :  { %v236_v0 = vrot.slane %v231_v62, %v235_v61  ;;  %v240_v1 = vrot.slane %v231_v62, %v239_v63 }
 0x17b   :  { %772 = vmatpush1.bf16.msra.mxu1 %v771_v3 }
 0x17c   :  { %774 = vmatprep.subr.bf16.mxu1 %v773_v4 }
 0x17f   :  { %776 = vmatpush1.bf16.msra.mxu1 %v775_v9  ;;  %v444_v9 = vld [vmem:[#allocation13] sm:$0xf] }
 0x180   :  { %778 = vmatprep.subr.bf16.mxu1 %v777_v10  ;;  %v460_v10 = vsub.s32 3, %v234_v60  ;;  %v449_v11 = vrot.slane %v444_v9, %v235_v61  ;;  %v457_v12 = vrot.slane %v444_v9, %v456_v8  ;;  %v453_v13 = vrot.slane %v444_v9, %v239_v63 }
 0x182   :  { %v461_v14 = vrot.slane %v444_v9, %v460_v10 }
 0x183   :  { %780 = vmatpush1.bf16.msra.mxu1 %v779_v15 }
 0x184   :  { %782 = vmatprep.subr.bf16.mxu1 %v781_v16 }
 0x187   :  { %784 = vmatpush1.bf16.msra.mxu1 %v783_v21 }
 0x188   :  { %786 = vmatprep.subr.bf16.mxu1 %v785_v22 }
 0x18b   :  { %788 = vmatpush1.bf16.msra.mxu1 %v787_v27 }
 0x18c   :  { %790 = vmatprep.subr.bf16.mxu1 %v789_v28 }
 0x18f   :  { %792 = vmatpush1.bf16.msra.mxu1 %v791_v33 }
 0x190   :  { %794 = vmatprep.subr.bf16.mxu1 %v793_v34 }
 0x193   :  { %796 = vmatpush1.bf16.msra.mxu1 %v795_v39 }
 0x194   :  { %798 = vmatprep.subr.bf16.mxu1 %v797_v40 }
 0x197   :  { %800 = vmatpush1.bf16.msra.mxu1 %v799_v46 }
 0x198   :  { %802 = vmatprep.subr.bf16.mxu1 %v801_v54 }
 0x19b   :  { %804 = vmatpush1.bf16.msra.mxu1 %v803_v58 }
 0x231   :  { %v309_v2 = vpop.f32.mrb[0].mxu1 }
 0x232   :  { %v310_v3 = vadd.f32 %v309_v2, %v236_v0  ;;  %v311_v4 = vpop.f32.mrb[1].mxu1 }
 0x233   :  { %v312_v5 = vadd.f32 %v311_v4, %v240_v1 }
 0x234   :  { %v314_v7 = vmax.f32 %v310_v3, 0.0 }
 0x235   :  { %v315_v6 = vmax.f32 %v312_v5, 0.0 }
 0x237   :  { %530 = vmatprep.mubr.f32.mxu0 %v315_v6  ;;  %601 = vmatprep.mubr.f32.mxu1 %v315_v6 }
 0x238   :  { %531 = vmatmul.mubr.f32.vlgmr.msra.gmra.mrb[2].mxu0 %v314_v7  ;;  %602 = vmatmul.mubr.f32.vlgmr.msra.gmra.mrb[2].mxu1 %v314_v7 }
 0x30b   :  { %v532_v15 = vpop.f32.mrb[2].mxu0  ;;  %v603_v16 = vpop.f32.mrb[2].mxu1 }
 0x30c   :  { %v533_v17 = vadd.f32 %v532_v15, %v449_v11  ;;  %v604_v18 = vadd.f32 %v603_v16, %v457_v12  ;;  %v534_v19 = vpop.f32.mrb[3].mxu0  ;;  %v605_v20 = vpop.f32.mrb[3].mxu1 }
 0x30d   :  { %v535_v21 = vadd.f32 %v534_v19, %v453_v13  ;;  %v606_v22 = vadd.f32 %v605_v20, %v461_v14 }
 0x30e   :  { %608 = vst [vmem:[#allocation14] sm:$0xff] %v533_v17  ;;  %610 = vst [vmem:[#allocation14 + $0x10] sm:$0xff] %v604_v18 }
 0x30f   :  { %609 = vst [vmem:[#allocation14 + $0x8] sm:$0xff] %v535_v21  ;;  %611 = vst [vmem:[#allocation14 + $0x18] sm:$0xff] %v606_v22 }
 0x310   :  { %987 = shalt.err (!%p984_p4)
}
 0x311   :  { %s988_s15 = scalar_lea.hbm %s1168_s7, 512 }
 0x312   :  { %p989_p5 = scmp.ne.s32.totalorder %s1168_s7, %s988_s15  ;;  %p992_p6 = scmp.lt.u32.totalorder %s988_s15, %s1168_s7 }
 0x314   :  { %p994_p7 = pnand %p992_p6, %p989_p5 }
 0x316   :  { %997 = shalt.err (!%p994_p7)
}
 0x317   :  { %621 = dma.vmem_to_hbm [thread:$0]  %s619_s13, 512, %s1168_s7, [#allocation4]  }
 0x318   :  { %1006 = dma.done.wait [#allocation4], 512  }
 0x319   :  { %1007 = vsyncadd [#allocation4], 4294966784 }
 0x31a   :  { %625 = vsyncpa [#allocation3], 1 }
 0x31b   :  { %626 = vsyncpa [#allocation6], 1 }
 0x31c   :  { %627 = vsyncpa [#allocation9], 1 }
 0x31d   :  { %628 = vsyncpa [#allocation12], 1 }
 0x31e   :  { %629 = vsyncpa [#allocation4], 1 }

</bundles_post_ra>
